<compile_context>
chip_gen: v6e
topology: v6e:2x2x1
jax: 0.10.0
libtpu: 0.0.40
codegen_flags: <defaults>
</compile_context>

<pallas_src>
import functools

import jax
import jax.numpy as jnp
from jax.experimental import pallas as pl
from jax.experimental.pallas import tpu as pltpu

_LANE = 128
_SUBLANE = 16          # bf16 packs 16 sublanes per vreg
_MAX_BATCH_TILE = 512

_PARALLEL = getattr(pltpu, "PARALLEL", "parallel")
_CORE_PARALLEL = getattr(pltpu, "CORE_PARALLEL", _PARALLEL)


def _round_up(x: int, m: int) -> int:
    return ((x + m - 1) // m) * m


def _pad2(a, rows: int, cols: int):
    pr, pc = rows - a.shape[0], cols - a.shape[1]
    if pr or pc:
        a = jnp.pad(a, ((0, pr), (0, pc)))
    return a


def _num_tensorcores() -> int:
    """Best-effort TensorCore-per-device count (v7x has 2). Falls back to 1."""
    try:
        info = pltpu.get_tpu_info()
        for attr in ("num_cores", "tensorcore_count", "cores_per_chip"):
            v = getattr(info, attr, None)
            if isinstance(v, int) and v > 1:
                return v
    except Exception:
        pass
    try:
        v = getattr(jax.devices()[0], "num_cores", None)
        if isinstance(v, int) and v > 0:
            return v
    except Exception:
        pass
    return 1


def _choose_batch_tile(B: int, n_cores: int = 1) -> int:
    """Single grid step on 1-TC chips (grid steps are a sequential loop there);
    >= n_cores steps only when multiple TensorCores can actually split the grid."""
    tile = _round_up(max(B, _SUBLANE), _SUBLANE)
    if n_cores > 1:
        per_core = _round_up(pl.cdiv(B, n_cores), _SUBLANE)
        tile = min(tile, max(per_core, _SUBLANE))
    return min(tile, _MAX_BATCH_TILE)


def _dim_semantics(num_steps: int, n_cores: int):
    if n_cores > 1 and num_steps >= n_cores:
        return (_CORE_PARALLEL,)   # actually splits the batch across v7x's 2 TCs
    return (_PARALLEL,)


def _vmem_limit_bytes(batch_tile, obs_dim, hid_p, act_p, obs_itemsize, param_bytes):
    io = 2 * batch_tile * (obs_dim * obs_itemsize + act_p * 4)   # double-buffered tiles
    scratch = 10 * batch_tile * hid_p * 4                        # generous f32 temporaries
    limit = param_bytes + io + scratch + (8 << 20)               # Mosaic headroom
    return int(max(16 << 20, min(limit, 96 << 20)))


def policy_kernel(obs_ref,
                  w1_ref, b1_ref, g1_ref, be1_ref,
                  w2_ref, b2_ref, g2_ref, be2_ref,
                  w3_ref, b3_ref,
                  out_ref,
                  *, act_scale: float, ln_dim: int):
    """One batch tile: Linear->LN->ELU, Linear->LN->ELU, Linear->Tanh->scale.

    hidden/act dims are zero-padded to lane multiples (128) in prepare_params;
    padded hidden columns carry exact zeros (weights/bias/gamma/beta zero-padded)
    so only the LayerNorm variance needs a validity mask — and only when
    hidden_dim is not already a multiple of 128 (static branch below).
    """
    hid_p = w1_ref.shape[1]
    need_mask = (ln_dim != hid_p)        # static: shapes known at trace time
    inv_n = 1.0 / float(ln_dim)

    if need_mask:
        # Hoisted once, shared by both LayerNorms (JAX does not CSE broadcasts).
        col = jax.lax.broadcasted_iota(jnp.int32, (1, hid_p), 1)
        valid = (col < ln_dim).astype(jnp.float32)

    def layernorm(h, g, b, eps=1e-5):
        mean = jnp.sum(h, axis=-1, keepdims=True) * inv_n   # pads are exact zeros
        hc = h - mean
        if need_mask:
            hc = hc * valid                                  # mask pads for variance
        var = jnp.sum(hc * hc, axis=-1, keepdims=True) * inv_n
        inv = jax.lax.rsqrt(var + eps)
        # Padded columns: gamma = beta = 0 -> output stays exactly 0 there.
        return (h - mean) * (inv * g) + b

    def elu(h):
        # TODO(synk): use expm1 once Mosaic lowers lax.expm1 (ulp-match torch.nn.ELU).
        return jnp.where(h > 0, h, jnp.exp(jnp.minimum(h, 0.0)) - 1.0)

    x = obs_ref[...]

    # Layer 1: Linear -> LayerNorm -> ELU   (LHS cast to weight dtype -> bf16 MXU rate)
    h = jnp.dot(x.astype(w1_ref.dtype), w1_ref[...],
                preferred_element_type=jnp.float32) + b1_ref[...]
    h = elu(layernorm(h, g1_ref[...], be1_ref[...]))

    # Layer 2: Linear -> LayerNorm -> ELU
    h = jnp.dot(h.astype(w2_ref.dtype), w2_ref[...],
                preferred_element_type=jnp.float32) + b2_ref[...]
    h = elu(layernorm(h, g2_ref[...], be2_ref[...]))

    # Output head: Linear -> Tanh -> scale
    a = jnp.dot(h.astype(w3_ref.dtype), w3_ref[...],
                preferred_element_type=jnp.float32) + b3_ref[...]
    out_ref[...] = (act_scale * jnp.tanh(a)).astype(out_ref.dtype)


def prepare_params(params, *, weight_dtype=jnp.bfloat16):
    """Pad (with zeros — required for LN correctness) and cast the params ONCE.

    Matmul weights go to `weight_dtype` (bf16 default -> bf16 MXU rate, f32 acc);
    biases / LayerNorm affine stay f32. Returns (padded_dict, static_dims_dict).
    Do NOT pass pre-padded params with garbage in the pad region.
    """
    obs_dim, hidden_dim = params["w1"].shape
    act_dim = params["w3"].shape[1]
    hid_p = _round_up(hidden_dim, _LANE)
    act_p = _round_up(act_dim, _LANE)

    def vec(v, cols):
        return _pad2(jnp.asarray(v, jnp.float32).reshape(1, -1), 1, cols)

    padded = dict(
        w1=_pad2(params["w1"].astype(weight_dtype), obs_dim, hid_p),
        b1=vec(params["b1"], hid_p),
        g1=vec(params["g1"], hid_p),
        be1=vec(params["be1"], hid_p),
        w2=_pad2(params["w2"].astype(weight_dtype), hid_p, hid_p),
        b2=vec(params["b2"], hid_p),
        g2=vec(params["g2"], hid_p),
        be2=vec(params["be2"], hid_p),
        w3=_pad2(params["w3"].astype(weight_dtype), hid_p, act_p),
        b3=vec(params["b3"], act_p),
    )
    dims = dict(hidden_dim=int(hidden_dim), act_dim=int(act_dim))
    return padded, dims


def deterministic_policy_forward(obs, padded_params, *, hidden_dim, act_dim,
                                 act_scale=1.0, batch_tile=None,
                                 return_padded=False):
    """obs: [B, obs_dim] (any float dtype). padded_params: from prepare_params.
    Returns [B, act_dim] f32 (or the padded [Bp, act_p] buffer if return_padded)."""
    B, obs_dim = obs.shape
    p = padded_params
    assert p["w1"].shape[0] == obs_dim, "obs_dim mismatch with prepared params"
    hid_p = p["w1"].shape[1]
    act_p = p["w3"].shape[1]

    n_cores = _num_tensorcores()
    if batch_tile is None:
        batch_tile = _choose_batch_tile(B, n_cores)
    num_steps = pl.cdiv(B, batch_tile)
    Bp = num_steps * batch_tile

    # Weights / biases / LN params: whole array resident in VMEM, single copy
    # (constant across the batch grid -> no per-step DMA, no double-buffering).
    vmem = pl.BlockSpec(memory_space=pltpu.MemorySpace.VMEM)

    kernel = functools.partial(policy_kernel,
                               act_scale=float(act_scale),
                               ln_dim=int(hidden_dim))

    param_bytes = sum(int(a.size) * a.dtype.itemsize for a in p.values())
    vmem_limit = _vmem_limit_bytes(batch_tile, obs_dim, hid_p, act_p,
                                   obs.dtype.itemsize, param_bytes)

    out = pl.pallas_call(
        kernel,
        out_shape=jax.ShapeDtypeStruct((Bp, act_p), jnp.float32),
        grid=(num_steps,),
        in_specs=[
            # obs at its TRUE width (full-extent last dim): no per-call pad copy,
            # no 17->128 byte inflation; ragged last batch block is fine (its
            # garbage rows never mix across rows and are sliced away).
            pl.BlockSpec((batch_tile, obs_dim), lambda i: (i, 0)),
            vmem, vmem, vmem, vmem,      # w1, b1, g1, be1
            vmem, vmem, vmem, vmem,      # w2, b2, g2, be2
            vmem, vmem,                  # w3, b3
        ],
        out_specs=pl.BlockSpec((batch_tile, act_p), lambda i: (i, 0)),
        compiler_params=pltpu.CompilerParams(
            dimension_semantics=_dim_semantics(num_steps, n_cores),
            vmem_limit_bytes=vmem_limit,
        ),
    )(obs, p["w1"], p["b1"], p["g1"], p["be1"],
      p["w2"], p["b2"], p["g2"], p["be2"],
      p["w3"], p["b3"])

    if return_padded:
        return out
    return out[:B, :act_dim]


class DeterministicPolicy:
    """Pallas-backed equivalent of the PyTorch module; pads/casts params once."""

    def __init__(self, params, act_scale=1.0, weight_dtype=jnp.bfloat16):
        self.params, dims = prepare_params(params, weight_dtype=weight_dtype)
        self.act_scale = float(act_scale)
        self._fwd = jax.jit(functools.partial(
            deterministic_policy_forward, act_scale=self.act_scale, **dims))

    def __call__(self, obs):
        return self._fwd(obs, self.params)


def init_params(key, obs_dim, hidden_dim, act_dim):
    """Mirror PyTorch nn.Linear defaults (U(-1/sqrt(fan_in), 1/sqrt(fan_in)));
    LayerNorm: gamma=1, beta=0. Weights stored [in, out] so y = x @ W + b."""
    ks = jax.random.split(key, 6)

    def lin(kw, kb, fan_in, fan_out):
        bound = 1.0 / jnp.sqrt(fan_in)
        w = jax.random.uniform(kw, (fan_in, fan_out), jnp.float32, -bound, bound)
        b = jax.random.uniform(kb, (1, fan_out), jnp.float32, -bound, bound)
        return w, b

    w1, b1 = lin(ks[0], ks[1], obs_dim, hidden_dim)
    w2, b2 = lin(ks[2], ks[3], hidden_dim, hidden_dim)
    w3, b3 = lin(ks[4], ks[5], hidden_dim, act_dim)
    return dict(
        w1=w1, b1=b1,
        g1=jnp.ones((1, hidden_dim), jnp.float32),
        be1=jnp.zeros((1, hidden_dim), jnp.float32),
        w2=w2, b2=b2,
        g2=jnp.ones((1, hidden_dim), jnp.float32),
        be2=jnp.zeros((1, hidden_dim), jnp.float32),
        w3=w3, b3=b3,
    )


def reference_forward(obs, params, act_scale=1.0):
    hp = jax.lax.Precision.HIGHEST

    def ln(x, g, b, eps=1e-5):
        m = x.mean(-1, keepdims=True)
        v = ((x - m) ** 2).mean(-1, keepdims=True)
        return (x - m) / jnp.sqrt(v + eps) * g + b

    def elu(x):
        return jnp.where(x > 0, x, jnp.exp(jnp.minimum(x, 0.0)) - 1.0)

    h = elu(ln(jnp.dot(obs, params["w1"], precision=hp) + params["b1"],
               params["g1"], params["be1"]))
    h = elu(ln(jnp.dot(h, params["w2"], precision=hp) + params["b2"],
               params["g2"], params["be2"]))
    return act_scale * jnp.tanh(jnp.dot(h, params["w3"], precision=hp) + params["b3"])


if __name__ == "__main__":
    key = jax.random.PRNGKey(0)
    k_obs, k_p1, k_p2 = jax.random.split(key, 3)

    batch, obs_dim, act_dim = 10, 17, 6
    act_scale = 2.5
    obs = jax.random.normal(k_obs, (batch, obs_dim), jnp.float32)

    # Test 1: ragged hidden (32 -> padded 128), f32 weights -> exercises the
    # masked-LayerNorm path with tight-ish tolerance.
    raw1 = init_params(k_p1, obs_dim, 32, act_dim)
    pol1 = DeterministicPolicy(raw1, act_scale=act_scale, weight_dtype=jnp.float32)
    out1 = jax.block_until_ready(pol1(obs))
    ref1 = reference_forward(obs, raw1, act_scale)
    assert out1.shape == (batch, act_dim)
    err1 = float(jnp.max(jnp.abs(out1 - ref1)))
    assert err1 < 2e-2, f"f32 / masked-LN path: max err {err1}"

    # Test 2: lane-aligned hidden (128), bf16 weights -> exercises the bf16 MXU
    # path and the mask-free LayerNorm branch (looser tolerance for bf16).
    raw2 = init_params(k_p2, obs_dim, 128, act_dim)
    pol2 = DeterministicPolicy(raw2, act_scale=act_scale, weight_dtype=jnp.bfloat16)
    out2 = jax.block_until_ready(pol2(obs))
    ref2 = reference_forward(obs, raw2, act_scale)
    assert out2.shape == (batch, act_dim)
    err2 = float(jnp.max(jnp.abs(out2 - ref2)))
    assert err2 < 1.5e-1, f"bf16 / mask-free path: max err {err2}"

    print("KERNEL_OK")
</pallas_src>

<mosaic_0001>
module attributes {stable_mosaic.version = 11 : i64} {
  func.func @policy_kernel(%arg0: i32, %arg1: memref<16x17xf32, #tpu.memory_space<vmem>>, %arg2: memref<17x128xf32, #tpu.memory_space<vmem>>, %arg3: memref<1x128xf32, #tpu.memory_space<vmem>>, %arg4: memref<1x128xf32, #tpu.memory_space<vmem>>, %arg5: memref<1x128xf32, #tpu.memory_space<vmem>>, %arg6: memref<128x128xf32, #tpu.memory_space<vmem>>, %arg7: memref<1x128xf32, #tpu.memory_space<vmem>>, %arg8: memref<1x128xf32, #tpu.memory_space<vmem>>, %arg9: memref<1x128xf32, #tpu.memory_space<vmem>>, %arg10: memref<128x128xf32, #tpu.memory_space<vmem>>, %arg11: memref<1x128xf32, #tpu.memory_space<vmem>>, %arg12: memref<16x128xf32, #tpu.memory_space<vmem>>) attributes {dimension_semantics = [#tpu.dimension_semantics<parallel>], iteration_bounds = array<i64: 1>, scalar_prefetch = 0 : i64, scratch_operands = 0 : i64, tpu.core_type = #tpu.core_type<tc>, window_params = [{transform_indices = @transform_0, window_bounds = array<i64: 16, 17>}, {pipeline_mode = #tpu.pipeline_mode<synchronous>, transform_indices = @transform_1, window_bounds = array<i64: 17, 128>}, {pipeline_mode = #tpu.pipeline_mode<synchronous>, transform_indices = @transform_2, window_bounds = array<i64: 1, 128>}, {pipeline_mode = #tpu.pipeline_mode<synchronous>, transform_indices = @transform_3, window_bounds = array<i64: 1, 128>}, {pipeline_mode = #tpu.pipeline_mode<synchronous>, transform_indices = @transform_4, window_bounds = array<i64: 1, 128>}, {pipeline_mode = #tpu.pipeline_mode<synchronous>, transform_indices = @transform_5, window_bounds = array<i64: 128, 128>}, {pipeline_mode = #tpu.pipeline_mode<synchronous>, transform_indices = @transform_6, window_bounds = array<i64: 1, 128>}, {pipeline_mode = #tpu.pipeline_mode<synchronous>, transform_indices = @transform_7, window_bounds = array<i64: 1, 128>}, {pipeline_mode = #tpu.pipeline_mode<synchronous>, transform_indices = @transform_8, window_bounds = array<i64: 1, 128>}, {pipeline_mode = #tpu.pipeline_mode<synchronous>, transform_indices = @transform_9, window_bounds = array<i64: 128, 128>}, {pipeline_mode = #tpu.pipeline_mode<synchronous>, transform_indices = @transform_10, window_bounds = array<i64: 1, 128>}, {transform_indices = @transform_11, window_bounds = array<i64: 16, 128>}]} {
    %0 = tpu.iota {dimensions = array<i32: 1>} : vector<1x128xi32>
    %c32_i32 = arith.constant 32 : i32
    %1 = vector.broadcast %c32_i32 : i32 to vector<1x128xi32>
    %2 = arith.cmpi slt, %0, %1 : vector<1x128xi32>
    %3 = arith.extui %2 : vector<1x128xi1> to vector<1x128xi32>
    %4 = arith.sitofp %3 : vector<1x128xi32> to vector<1x128xf32>
    %c0 = arith.constant 0 : index
    %c0_0 = arith.constant 0 : index
    %5 = vector.load %arg1[%c0, %c0_0] : memref<16x17xf32, #tpu.memory_space<vmem>>, vector<16x17xf32>
    %c0_1 = arith.constant 0 : index
    %c0_2 = arith.constant 0 : index
    %6 = vector.load %arg2[%c0_1, %c0_2] : memref<17x128xf32, #tpu.memory_space<vmem>>, vector<17x128xf32>
    %cst = arith.constant dense<0.000000e+00> : vector<16x128xf32>
    %7 = tpu.matmul %5, %6, %cst {dimension_numbers = #tpu.dot_dimension_numbers<[1], [0], [0], [1], [0, 0, 1, 1], [], []>} : vector<16x17xf32>, vector<17x128xf32>, vector<16x128xf32> -> vector<16x128xf32>
    %c0_3 = arith.constant 0 : index
    %c0_4 = arith.constant 0 : index
    %8 = vector.load %arg3[%c0_3, %c0_4] : memref<1x128xf32, #tpu.memory_space<vmem>>, vector<1x128xf32>
    %9 = vector.broadcast %8 : vector<1x128xf32> to vector<16x128xf32>
    %10 = arith.addf %7, %9 : vector<16x128xf32>
    %c0_5 = arith.constant 0 : index
    %c0_6 = arith.constant 0 : index
    %11 = vector.load %arg4[%c0_5, %c0_6] : memref<1x128xf32, #tpu.memory_space<vmem>>, vector<1x128xf32>
    %c0_7 = arith.constant 0 : index
    %c0_8 = arith.constant 0 : index
    %12 = vector.load %arg5[%c0_7, %c0_8] : memref<1x128xf32, #tpu.memory_space<vmem>>, vector<1x128xf32>
    %cst_9 = arith.constant dense<0.000000e+00> : vector<16xf32>
    %13 = vector.multi_reduction <add>, %10, %cst_9 [1] : vector<16x128xf32> to vector<16xf32>
    %14 = vector.shape_cast %13 : vector<16xf32> to vector<16x1xf32>
    %cst_10 = arith.constant 3.125000e-02 : f32
    %15 = vector.broadcast %cst_10 : f32 to vector<16x1xf32>
    %16 = arith.mulf %14, %15 : vector<16x1xf32>
    %17 = vector.broadcast %16 : vector<16x1xf32> to vector<16x128xf32>
    %18 = arith.subf %10, %17 : vector<16x128xf32>
    %19 = vector.broadcast %4 : vector<1x128xf32> to vector<16x128xf32>
    %20 = arith.mulf %18, %19 : vector<16x128xf32>
    %21 = arith.mulf %20, %20 : vector<16x128xf32>
    %cst_11 = arith.constant dense<0.000000e+00> : vector<16xf32>
    %22 = vector.multi_reduction <add>, %21, %cst_11 [1] : vector<16x128xf32> to vector<16xf32>
    %23 = vector.shape_cast %22 : vector<16xf32> to vector<16x1xf32>
    %cst_12 = arith.constant 3.125000e-02 : f32
    %24 = vector.broadcast %cst_12 : f32 to vector<16x1xf32>
    %25 = arith.mulf %23, %24 : vector<16x1xf32>
    %cst_13 = arith.constant 9.99999974E-6 : f32
    %26 = vector.broadcast %cst_13 : f32 to vector<16x1xf32>
    %27 = arith.addf %25, %26 : vector<16x1xf32>
    %28 = math.rsqrt %27 : vector<16x1xf32>
    %29 = vector.broadcast %16 : vector<16x1xf32> to vector<16x128xf32>
    %30 = arith.subf %10, %29 : vector<16x128xf32>
    %31 = vector.broadcast %28 : vector<16x1xf32> to vector<16x128xf32>
    %32 = vector.broadcast %11 : vector<1x128xf32> to vector<16x128xf32>
    %33 = arith.mulf %31, %32 : vector<16x128xf32>
    %34 = arith.mulf %30, %33 : vector<16x128xf32>
    %35 = vector.broadcast %12 : vector<1x128xf32> to vector<16x128xf32>
    %36 = arith.addf %34, %35 : vector<16x128xf32>
    %cst_14 = arith.constant 0.000000e+00 : f32
    %37 = vector.broadcast %cst_14 : f32 to vector<16x128xf32>
    %38 = arith.cmpf ogt, %36, %37 : vector<16x128xf32>
    %cst_15 = arith.constant 0.000000e+00 : f32
    %39 = vector.broadcast %cst_15 : f32 to vector<16x128xf32>
    %40 = arith.minimumf %36, %39 : vector<16x128xf32>
    %41 = math.exp %40 : vector<16x128xf32>
    %cst_16 = arith.constant 1.000000e+00 : f32
    %42 = vector.broadcast %cst_16 : f32 to vector<16x128xf32>
    %43 = arith.subf %41, %42 : vector<16x128xf32>
    %44 = arith.select %38, %36, %43 : vector<16x128xi1>, vector<16x128xf32>
    %c0_17 = arith.constant 0 : index
    %c0_18 = arith.constant 0 : index
    %45 = vector.load %arg6[%c0_17, %c0_18] : memref<128x128xf32, #tpu.memory_space<vmem>>, vector<128x128xf32>
    %cst_19 = arith.constant dense<0.000000e+00> : vector<16x128xf32>
    %46 = tpu.matmul %44, %45, %cst_19 {dimension_numbers = #tpu.dot_dimension_numbers<[1], [0], [0], [1], [0, 0, 1, 1], [], []>} : vector<16x128xf32>, vector<128x128xf32>, vector<16x128xf32> -> vector<16x128xf32>
    %c0_20 = arith.constant 0 : index
    %c0_21 = arith.constant 0 : index
    %47 = vector.load %arg7[%c0_20, %c0_21] : memref<1x128xf32, #tpu.memory_space<vmem>>, vector<1x128xf32>
    %48 = vector.broadcast %47 : vector<1x128xf32> to vector<16x128xf32>
    %49 = arith.addf %46, %48 : vector<16x128xf32>
    %c0_22 = arith.constant 0 : index
    %c0_23 = arith.constant 0 : index
    %50 = vector.load %arg8[%c0_22, %c0_23] : memref<1x128xf32, #tpu.memory_space<vmem>>, vector<1x128xf32>
    %c0_24 = arith.constant 0 : index
    %c0_25 = arith.constant 0 : index
    %51 = vector.load %arg9[%c0_24, %c0_25] : memref<1x128xf32, #tpu.memory_space<vmem>>, vector<1x128xf32>
    %cst_26 = arith.constant dense<0.000000e+00> : vector<16xf32>
    %52 = vector.multi_reduction <add>, %49, %cst_26 [1] : vector<16x128xf32> to vector<16xf32>
    %53 = vector.shape_cast %52 : vector<16xf32> to vector<16x1xf32>
    %cst_27 = arith.constant 3.125000e-02 : f32
    %54 = vector.broadcast %cst_27 : f32 to vector<16x1xf32>
    %55 = arith.mulf %53, %54 : vector<16x1xf32>
    %56 = vector.broadcast %55 : vector<16x1xf32> to vector<16x128xf32>
    %57 = arith.subf %49, %56 : vector<16x128xf32>
    %58 = vector.broadcast %4 : vector<1x128xf32> to vector<16x128xf32>
    %59 = arith.mulf %57, %58 : vector<16x128xf32>
    %60 = arith.mulf %59, %59 : vector<16x128xf32>
    %cst_28 = arith.constant dense<0.000000e+00> : vector<16xf32>
    %61 = vector.multi_reduction <add>, %60, %cst_28 [1] : vector<16x128xf32> to vector<16xf32>
    %62 = vector.shape_cast %61 : vector<16xf32> to vector<16x1xf32>
    %cst_29 = arith.constant 3.125000e-02 : f32
    %63 = vector.broadcast %cst_29 : f32 to vector<16x1xf32>
    %64 = arith.mulf %62, %63 : vector<16x1xf32>
    %cst_30 = arith.constant 9.99999974E-6 : f32
    %65 = vector.broadcast %cst_30 : f32 to vector<16x1xf32>
    %66 = arith.addf %64, %65 : vector<16x1xf32>
    %67 = math.rsqrt %66 : vector<16x1xf32>
    %68 = vector.broadcast %55 : vector<16x1xf32> to vector<16x128xf32>
    %69 = arith.subf %49, %68 : vector<16x128xf32>
    %70 = vector.broadcast %67 : vector<16x1xf32> to vector<16x128xf32>
    %71 = vector.broadcast %50 : vector<1x128xf32> to vector<16x128xf32>
    %72 = arith.mulf %70, %71 : vector<16x128xf32>
    %73 = arith.mulf %69, %72 : vector<16x128xf32>
    %74 = vector.broadcast %51 : vector<1x128xf32> to vector<16x128xf32>
    %75 = arith.addf %73, %74 : vector<16x128xf32>
    %cst_31 = arith.constant 0.000000e+00 : f32
    %76 = vector.broadcast %cst_31 : f32 to vector<16x128xf32>
    %77 = arith.cmpf ogt, %75, %76 : vector<16x128xf32>
    %cst_32 = arith.constant 0.000000e+00 : f32
    %78 = vector.broadcast %cst_32 : f32 to vector<16x128xf32>
    %79 = arith.minimumf %75, %78 : vector<16x128xf32>
    %80 = math.exp %79 : vector<16x128xf32>
    %cst_33 = arith.constant 1.000000e+00 : f32
    %81 = vector.broadcast %cst_33 : f32 to vector<16x128xf32>
    %82 = arith.subf %80, %81 : vector<16x128xf32>
    %83 = arith.select %77, %75, %82 : vector<16x128xi1>, vector<16x128xf32>
    %c0_34 = arith.constant 0 : index
    %c0_35 = arith.constant 0 : index
    %84 = vector.load %arg10[%c0_34, %c0_35] : memref<128x128xf32, #tpu.memory_space<vmem>>, vector<128x128xf32>
    %cst_36 = arith.constant dense<0.000000e+00> : vector<16x128xf32>
    %85 = tpu.matmul %83, %84, %cst_36 {dimension_numbers = #tpu.dot_dimension_numbers<[1], [0], [0], [1], [0, 0, 1, 1], [], []>} : vector<16x128xf32>, vector<128x128xf32>, vector<16x128xf32> -> vector<16x128xf32>
    %c0_37 = arith.constant 0 : index
    %c0_38 = arith.constant 0 : index
    %86 = vector.load %arg11[%c0_37, %c0_38] : memref<1x128xf32, #tpu.memory_space<vmem>>, vector<1x128xf32>
    %87 = vector.broadcast %86 : vector<1x128xf32> to vector<16x128xf32>
    %88 = arith.addf %85, %87 : vector<16x128xf32>
    %89 = math.tanh %88 : vector<16x128xf32>
    %cst_39 = arith.constant 2.500000e+00 : f32
    %90 = vector.broadcast %cst_39 : f32 to vector<16x128xf32>
    %91 = arith.mulf %90, %89 : vector<16x128xf32>
    %c0_40 = arith.constant 0 : index
    %c0_41 = arith.constant 0 : index
    %92 = vector.load %arg12[%c0_40, %c0_41] : memref<16x128xf32, #tpu.memory_space<vmem>>, vector<16x128xf32>
    tpu.vector_store %arg12[%c0_40, %c0_41], %91 {strides = array<i32>} : memref<16x128xf32, #tpu.memory_space<vmem>>, vector<16x128xf32>,
    return
  }
  func.func @transform_0(%arg0: i32) -> (i32, i32) {
    %c0_i32 = arith.constant 0 : i32
    %c0_i32_0 = arith.constant 0 : i32
    return %arg0, %c0_i32 : i32, i32
  }
  func.func @transform_1(%arg0: i32) -> (i32, i32) {
    %c0_i32 = arith.constant 0 : i32
    %c0_i32_0 = arith.constant 0 : i32
    %c0_i32_1 = arith.constant 0 : i32
    return %c0_i32, %c0_i32_0 : i32, i32
  }
  func.func @transform_2(%arg0: i32) -> (i32, i32) {
    %c0_i32 = arith.constant 0 : i32
    %c0_i32_0 = arith.constant 0 : i32
    %c0_i32_1 = arith.constant 0 : i32
    return %c0_i32, %c0_i32_0 : i32, i32
  }
  func.func @transform_3(%arg0: i32) -> (i32, i32) {
    %c0_i32 = arith.constant 0 : i32
    %c0_i32_0 = arith.constant 0 : i32
    %c0_i32_1 = arith.constant 0 : i32
    return %c0_i32, %c0_i32_0 : i32, i32
  }
  func.func @transform_4(%arg0: i32) -> (i32, i32) {
    %c0_i32 = arith.constant 0 : i32
    %c0_i32_0 = arith.constant 0 : i32
    %c0_i32_1 = arith.constant 0 : i32
    return %c0_i32, %c0_i32_0 : i32, i32
  }
  func.func @transform_5(%arg0: i32) -> (i32, i32) {
    %c0_i32 = arith.constant 0 : i32
    %c0_i32_0 = arith.constant 0 : i32
    %c0_i32_1 = arith.constant 0 : i32
    return %c0_i32, %c0_i32_0 : i32, i32
  }
  func.func @transform_6(%arg0: i32) -> (i32, i32) {
    %c0_i32 = arith.constant 0 : i32
    %c0_i32_0 = arith.constant 0 : i32
    %c0_i32_1 = arith.constant 0 : i32
    return %c0_i32, %c0_i32_0 : i32, i32
  }
  func.func @transform_7(%arg0: i32) -> (i32, i32) {
    %c0_i32 = arith.constant 0 : i32
    %c0_i32_0 = arith.constant 0 : i32
    %c0_i32_1 = arith.constant 0 : i32
    return %c0_i32, %c0_i32_0 : i32, i32
  }
  func.func @transform_8(%arg0: i32) -> (i32, i32) {
    %c0_i32 = arith.constant 0 : i32
    %c0_i32_0 = arith.constant 0 : i32
    %c0_i32_1 = arith.constant 0 : i32
    return %c0_i32, %c0_i32_0 : i32, i32
  }
  func.func @transform_9(%arg0: i32) -> (i32, i32) {
    %c0_i32 = arith.constant 0 : i32
    %c0_i32_0 = arith.constant 0 : i32
    %c0_i32_1 = arith.constant 0 : i32
    return %c0_i32, %c0_i32_0 : i32, i32
  }
  func.func @transform_10(%arg0: i32) -> (i32, i32) {
    %c0_i32 = arith.constant 0 : i32
    %c0_i32_0 = arith.constant 0 : i32
    %c0_i32_1 = arith.constant 0 : i32
    return %c0_i32, %c0_i32_0 : i32, i32
  }
  func.func @transform_11(%arg0: i32) -> (i32, i32) {
    %c0_i32 = arith.constant 0 : i32
    %c0_i32_0 = arith.constant 0 : i32
    return %arg0, %c0_i32 : i32, i32
  }
}

</mosaic_0001>

<bundles_post_ra>
// kernel: deterministic_policy_forward.1
= control target key start
LH: loop header
LB: loop body
LE: loop exit
PB: predicated region body
PF: predicated region fallthrough
CT: control target
= control target key end

     0   :  { %16 = vsyncpa [#allocation3], 0  ;;  %s971_s0 = inlined_call_operand.hbm [shape: f32[10,17], index: 0, kind: input, shape index: {}]   ;;  %s972_s1 = inlined_call_operand.hbm [shape: f32[17,128], index: 1, kind: input, shape index: {}]   ;;  %s973_s2 = inlined_call_operand.vmem [shape: f32[1,128], index: 2, kind: input, shape index: {}]   ;;  %s974_s3 = inlined_call_operand.vmem [shape: f32[1,128], index: 3, kind: input, shape index: {}]   ;;  %s975_s4 = inlined_call_operand.vmem [shape: f32[1,128], index: 4, kind: input, shape index: {}]   ;;  %s976_s5 = inlined_call_operand.hbm [shape: f32[128,128], index: 5, kind: input, shape index: {}]   ;;  %s977_s6 = inlined_call_operand.hbm [shape: f32[1,128], index: 6, kind: input, shape index: {}]   ;;  %s978_s7 = inlined_call_operand.vmem [shape: f32[1,128], index: 7, kind: input, shape index: {}]   ;;  %s979_s8 = inlined_call_operand.vmem [shape: f32[1,128], index: 8, kind: input, shape index: {}]   ;;  %s980_s9 = inlined_call_operand.hbm [shape: f32[128,128], index: 9, kind: input, shape index: {}]   ;;  %s981_s10 = inlined_call_operand.hbm [shape: f32[1,128], index: 10, kind: input, shape index: {}]   ;;  %s982_s11 = inlined_call_operand.vmem [shape: f32[16,128], index: 11, kind: output, shape index: {}]  }
   0x1   :  { %17 = vsyncpa [#allocation5], 0 }
   0x2   :  { %18 = vsyncpa [#allocation8], 0 }
   0x3   :  { %19 = vsyncpa [#allocation11], 0  ;;  %s829_s17 = smov [#allocation4]   ;;  %s830_s19 = smov [#allocation7]  }
   0x4   :  { %s37_s18 = sshll.u32 %s829_s17, 4  ;;  %s68_s20 = sshll.u32 %s830_s19, 4  ;;  %s38_s18 = int_to_ptr.vmem [resolvable:$true] %s37_s18  ;;  %s69_s20 = int_to_ptr.vmem [resolvable:$true] %s68_s20 }
   0x5   :  { %s709_s21 = scalar_lea.vmem %s38_s18, 384  ;;  %p714_p1 = scmp.lt.s32.totalorder %s38_s18, %s38_s18 }
   0x6   :  { %p710_p0 = scmp.ne.s32.totalorder %s38_s18, %s709_s21  ;;  %p715_p2 = scmp.lt.s32.totalorder %s709_s21, %s709_s21 }
   0x8   :  { %p716_p3 = por %p715_p2, %p714_p1 }
   0xa   :  { %p717_p4 = pnand %p716_p3, %p710_p0 }
   0xc   :  { %720 = shalt.err (!%p717_p4)
}
   0xd   :  { %s831_s22 = smov 128   ;;  %s832_s23 = smov 8  }
   0xe   :  { %43 = dma.hbm_to_vmem [thread:$0]  %s972_s1, 384, %s38_s18, [#allocation5], %s831_s22, %s831_s22, %s832_s23  }
   0xf   :  { %s729_s26 = scalar_lea.vmem %s69_s20, 16  ;;  %s733_s27 = scalar_lea.vmem %s69_s20, 32 }
  0x10   :  { %p730_p5 = scmp.ne.s32.totalorder %s69_s20, %s729_s26  ;;  %p734_p6 = scmp.lt.s32.totalorder %s69_s20, %s69_s20 }
  0x11   :  { %p735_p7 = scmp.lt.s32.totalorder %s733_s27, %s729_s26 }
  0x13   :  { %p736_p8 = por %p735_p7, %p734_p6 }
  0x15   :  { %p737_p9 = pnand %p736_p8, %p730_p5 }
  0x17   :  { %740 = shalt.err (!%p737_p9)
}
  0x18   :  { %71 = dma.hbm_to_vmem [thread:$0]  %s977_s6, 16, %s69_s20, [#allocation8]  }
  0x19   :  { %s833_s30 = smov [#allocation2]   ;;  %s834_s13 = smov [#allocation6]  }
  0x1a   :  { %s25_s12 = sshll.u32 %s833_s30, 4  ;;  %s55_s14 = sshll.u32 %s834_s13, 4  ;;  %s26_s12 = int_to_ptr.vmem [resolvable:$true] %s25_s12  ;;  %s56_s14 = int_to_ptr.vmem [resolvable:$true] %s55_s14 }
  0x1b   :  { %s749_s15 = scalar_lea.vmem %s26_s12, 256  ;;  %p754_p11 = scmp.lt.s32.totalorder %s26_s12, %s26_s12 }
  0x1c   :  { %p750_p10 = scmp.ne.s32.totalorder %s26_s12, %s749_s15  ;;  %p755_p12 = scmp.lt.s32.totalorder %s749_s15, %s749_s15 }
  0x1e   :  { %p756_p13 = por %p755_p12, %p754_p11 }
  0x20   :  { %p757_p0 = pnand %p756_p13, %p750_p10 }
  0x22   :  { %760 = shalt.err (!%p757_p0)
}
  0x23   :  { %31 = dma.hbm_to_vmem [thread:$0]  %s971_s0, 256, %s26_s12, [#allocation3], %s831_s22, %s831_s22, %s832_s23  }
  0x24   :  { %s769_s6 = scalar_lea.vmem %s56_s14, 2048  ;;  %p774_p2 = scmp.lt.s32.totalorder %s56_s14, %s56_s14 }
  0x25   :  { %p770_p1 = scmp.ne.s32.totalorder %s56_s14, %s769_s6  ;;  %p775_p3 = scmp.lt.s32.totalorder %s769_s6, %s769_s6 }
  0x27   :  { %p776_p4 = por %p775_p3, %p774_p2 }
  0x29   :  { %p777_p5 = pnand %p776_p4, %p770_p1 }
  0x2b   :  { %780 = shalt.err (!%p777_p5)
}
  0x2c   :  { %61 = dma.hbm_to_vmem [thread:$0]  %s976_s5, 2048, %s56_s14, [#allocation5], %s831_s22, %s831_s22, %s832_s23  }
  0x2d   :  { %s835_s19 = smov [#allocation9]   ;;  %s836_s21 = smov [#allocation10]  }
  0x2e   :  { %s81_s20 = sshll.u32 %s835_s19, 4  ;;  %s94_s24 = sshll.u32 %s836_s21, 4  ;;  %s82_s20 = int_to_ptr.vmem [resolvable:$true] %s81_s20  ;;  %s95_s24 = int_to_ptr.vmem [resolvable:$true] %s94_s24 }
  0x2f   :  { %s789_s0 = scalar_lea.vmem %s82_s20, 2048  ;;  %p794_p7 = scmp.lt.s32.totalorder %s82_s20, %s82_s20 }
  0x30   :  { %p790_p6 = scmp.ne.s32.totalorder %s82_s20, %s789_s0  ;;  %p795_p8 = scmp.lt.s32.totalorder %s789_s0, %s789_s0 }
  0x32   :  { %p796_p9 = por %p795_p8, %p794_p7 }
  0x34   :  { %p797_p10 = pnand %p796_p9, %p790_p6 }
  0x36   :  { %800 = shalt.err (!%p797_p10)
}
  0x37   :  { %87 = dma.hbm_to_vmem [thread:$0]  %s980_s9, 2048, %s82_s20, [#allocation8], %s831_s22, %s831_s22, %s832_s23  }
  0x38   :  { %s809_s5 = scalar_lea.vmem %s95_s24, 16  ;;  %s813_s27 = scalar_lea.vmem %s95_s24, 32 }
  0x39   :  { %p810_p11 = scmp.ne.s32.totalorder %s95_s24, %s809_s5  ;;  %p814_p12 = scmp.lt.s32.totalorder %s95_s24, %s95_s24 }
  0x3a   :  { %p815_p13 = scmp.lt.s32.totalorder %s813_s27, %s809_s5 }
  0x3c   :  { %p816_p0 = por %p815_p13, %p814_p12 }
  0x3e   :  { %p817_p1 = pnand %p816_p0, %p810_p11 }
  0x40   :  { %820 = shalt.err (!%p817_p1)
}
  0x41   :  { %97 = dma.hbm_to_vmem [thread:$0]  %s981_s10, 16, %s95_s24, [#allocation11]  }
  0x42   :  { %821 = dma.done.wait [#allocation3], 256  }
  0x43   :  { %822 = vsyncadd [#allocation3], 4294967040 }
  0x44   :  { %823 = dma.done.wait [#allocation5], 2432  }
  0x45   :  { %824 = vsyncadd [#allocation5], 4294964864 }
  0x46   :  { %825 = dma.done.wait [#allocation8], 2064  }
  0x47   :  { %826 = vsyncadd [#allocation8], 4294965232 }
  0x48   :  { %827 = dma.done.wait [#allocation11], 16  }
  0x49   :  { %828 = vsyncadd [#allocation11], 4294967280  ;;  %vm140_vm0 = vcmask 1040384   ;;  %vm133_vm1 = vcmask 138240   ;;  %v125_v0 = vld [vmem:[#allocation4 + $0x10] sm:$0x1]  ;;  %v116_v10 = vlaneseq }
  0x4a   :  { %v124_v1 = vld [vmem:[#allocation4 + $0x8] sm:$0xff]  ;;  %593 = vmatprep.subr.msk.mxu0 %vm140_vm0, %v125_v0  ;;  %v121_v2 = vld [vmem:[#allocation2] sm:$0xff]  ;;  %v123_v3 = vld [vmem:[#allocation4] sm:$0xff]  ;;  %v837_v14 = vmov 0.0  }
  0x4b   :  { %594 = vmatpush3.msk.msra.mxu0 %vm140_vm0, %v125_v0  ;;  %599 = vmatprep.mubr.msk.f32.mxu0 %vm133_vm1, %v121_v2  ;;  %v122_v4 = vld [vmem:[#allocation2 + $0x8] sm:$0xff]  ;;  %v538_v6 = vld [vmem:[%s973_s2] ss:$0 sm:$0xff]  ;;  %v117_v11 = vand.u32 127, %v116_v10  ;;  %v287_v25 = vld [vmem:[#allocation6 + $0x70] sm:$0xff] }
  0x4c   :  { %595 = vmatprep.subr.mxu0 %v124_v1  ;;  %v288_v24 = vld [vmem:[#allocation6 + $0x78] sm:$0xff]  ;;  %v286_v26 = vld [vmem:[#allocation6 + $0x68] sm:$0xff]  ;;  %v285_v27 = vld [vmem:[#allocation6 + $0x60] sm:$0xff] }
  0x4d   :  { %596 = vmatpush3.msra.mxu0 %v124_v1  ;;  %vm118_vm2 = vcmp.lt.s32.totalorder %v117_v11, 32  ;;  %602 = vmatprep.subr.mxu1 %v288_v24  ;;  %v284_v28 = vld [vmem:[#allocation6 + $0x58] sm:$0xff]  ;;  %v283_v29 = vld [vmem:[#allocation6 + $0x50] sm:$0xff]  ;;  %v282_v30 = vld [vmem:[#allocation6 + $0x48] sm:$0xff] }
  0x4e   :  { %597 = vmatprep.subr.mxu0 %v123_v3  ;;  %v931_v15 = vsel %vm118_vm2, 1.0, %v837_v14  ;;  %603 = vmatpush3.msra.mxu1 %v288_v24  ;;  %v281_v31 = vld [vmem:[#allocation6 + $0x40] sm:$0xff]  ;;  %v280_v32 = vld [vmem:[#allocation6 + $0x38] sm:$0xff]  ;;  %v279_v33 = vld [vmem:[#allocation6 + $0x30] sm:$0xff] }
  0x4f   :  { %598 = vmatpush3.msra.mxu0 %v123_v3  ;;  %604 = vmatprep.subr.mxu1 %v287_v25  ;;  %v278_v34 = vld [vmem:[#allocation6 + $0x28] sm:$0xff]  ;;  %v277_v35 = vld [vmem:[#allocation6 + $0x20] sm:$0xff]  ;;  %v276_v36 = vld [vmem:[#allocation6 + $0x18] sm:$0xff] }
  0x50   :  { %600 = vmatmul.mubr.msk.f32.vlgmr.msra.gmra.mxu0 %vm133_vm1, %v122_v4  ;;  %605 = vmatpush3.msra.mxu1 %v287_v25  ;;  %v275_v37 = vld [vmem:[#allocation6 + $0x10] sm:$0xff]  ;;  %v274_v38 = vld [vmem:[#allocation6 + $0x8] sm:$0xff]  ;;  %v273_v39 = vld [vmem:[#allocation6] sm:$0xff] }
  0x51   :  { %606 = vmatprep.subr.mxu1 %v286_v26  ;;  %v542_v46 = vld [vmem:[%s974_s3] ss:$0 sm:$0xff]  ;;  %v546_v2 = vld [vmem:[#allocation7] ss:$0 sm:$0xff]  ;;  %v433_v24 = vld [vmem:[#allocation9 + $0x40] sm:$0xff] }
  0x52   :  { %607 = vmatpush3.msra.mxu1 %v286_v26  ;;  %v543_v49 = vld [vmem:[%s975_s4] ss:$0 sm:$0xff]  ;;  %v432_v25 = vld [vmem:[#allocation9 + $0x38] sm:$0xff] }
  0x53   :  { %608 = vmatprep.subr.mxu1 %v285_v27  ;;  %v431_v26 = vld [vmem:[#allocation9 + $0x30] sm:$0xff] }
  0x54   :  { %609 = vmatpush3.msra.mxu1 %v285_v27  ;;  %v430_v27 = vld [vmem:[#allocation9 + $0x28] sm:$0xff] }
  0x55   :  { %610 = vmatprep.subr.mxu1 %v284_v28 }
  0x56   :  { %611 = vmatpush3.msra.mxu1 %v284_v28  ;;  %v429_v28 = vld [vmem:[#allocation9 + $0x20] sm:$0xff] }
  0x57   :  { %612 = vmatprep.subr.mxu1 %v283_v29 }
  0x58   :  { %613 = vmatpush3.msra.mxu1 %v283_v29  ;;  %v428_v29 = vld [vmem:[#allocation9 + $0x18] sm:$0xff] }
  0x59   :  { %614 = vmatprep.subr.mxu1 %v282_v30 }
  0x5a   :  { %615 = vmatpush3.msra.mxu1 %v282_v30  ;;  %v427_v30 = vld [vmem:[#allocation9 + $0x10] sm:$0xff] }
  0x5b   :  { %616 = vmatprep.subr.mxu1 %v281_v31 }
  0x5c   :  { %617 = vmatpush3.msra.mxu1 %v281_v31  ;;  %v426_v31 = vld [vmem:[#allocation9 + $0x8] sm:$0xff] }
  0x5d   :  { %618 = vmatprep.subr.mxu1 %v280_v32 }
  0x5e   :  { %619 = vmatpush3.msra.mxu1 %v280_v32  ;;  %v425_v32 = vld [vmem:[#allocation9] sm:$0xff] }
  0x5f   :  { %620 = vmatprep.subr.mxu1 %v279_v33 }
  0x60   :  { %621 = vmatpush3.msra.mxu1 %v279_v33 }
  0x61   :  { %622 = vmatprep.subr.mxu1 %v278_v34 }
  0x62   :  { %623 = vmatpush3.msra.mxu1 %v278_v34 }
  0x63   :  { %624 = vmatprep.subr.mxu1 %v277_v35 }
  0x64   :  { %625 = vmatpush3.msra.mxu1 %v277_v35 }
  0x65   :  { %626 = vmatprep.subr.mxu1 %v276_v36 }
  0x66   :  { %627 = vmatpush3.msra.mxu1 %v276_v36 }
  0x67   :  { %628 = vmatprep.subr.mxu1 %v275_v37 }
  0x68   :  { %629 = vmatpush3.msra.mxu1 %v275_v37 }
  0x69   :  { %630 = vmatprep.subr.mxu1 %v274_v38 }
  0x6a   :  { %631 = vmatpush3.msra.mxu1 %v274_v38 }
  0x6b   :  { %632 = vmatprep.subr.mxu1 %v273_v39 }
  0x6c   :  { %633 = vmatpush3.msra.mxu1 %v273_v39  ;;  %v547_v39 = vld [vmem:[%s978_s7] ss:$0 sm:$0xff] }
 0x110   :  { %v601_v5 = vpop.f32.mrf.mxu0 }
 0x111   :  { %v216_v9 = vadd.f32 %v601_v5, %v538_v6 }
 0x112   :  { %v210_v7 = vpop.f32.mrf.mxu0 }
 0x113   :  { %v211_v8 = vadd.f32 %v538_v6, %v210_v7 }
 0x115   :  { %221 = vadd.xlane.f32.xlu0 %v211_v8 }
 0x119   :  { %223 = vadd.xlane.f32.xlu0 %v216_v9 }
 0x19e   :  { %v222_v12 = vpop.xlane.xlu0 %221 }
 0x19f   :  { %v225_v13 = vmul.f32 0.03125, %v222_v12 }
 0x1a1   :  { %v933_v16 = vsub.f32 %v211_v8, %v225_v13 }
 0x1a2   :  { %v224_v17 = vpop.xlane.xlu0 %223 }
 0x1a3   :  { %v226_v18 = vmul.f32 0.03125, %v224_v17  ;;  %v229_v19 = vmul.f32 %v931_v15, %v933_v16 }
 0x1a5   :  { %v937_v20 = vsub.f32 %v216_v9, %v226_v18  ;;  %v231_v21 = vmul.f32 %v229_v19, %v229_v19  ;;  %v440_v18 = vld [vmem:[#allocation9 + $0x78] sm:$0xff]  ;;  %v439_v19 = vld [vmem:[#allocation9 + $0x70] sm:$0xff] }
 0x1a6   :  { %637 = vmatprep.subr.mxu0 %v440_v18 }
 0x1a7   :  { %233 = vadd.xlane.f32.xlu1 %v231_v21  ;;  %v230_v22 = vmul.f32 %v931_v15, %v937_v20  ;;  %638 = vmatpush3.msra.mxu0 %v440_v18  ;;  %v437_v21 = vld [vmem:[#allocation9 + $0x60] sm:$0xff] }
 0x1a8   :  { %639 = vmatprep.subr.mxu0 %v439_v19 }
 0x1a9   :  { %v232_v23 = vmul.f32 %v230_v22, %v230_v22  ;;  %640 = vmatpush3.msra.mxu0 %v439_v19  ;;  %v436_v22 = vld [vmem:[#allocation9 + $0x58] sm:$0xff] }
 0x1ab   :  { %235 = vadd.xlane.f32.xlu1 %v232_v23  ;;  %v435_v23 = vld [vmem:[#allocation9 + $0x50] sm:$0xff] }
 0x230   :  { %v234_v40 = vpop.xlane.xlu1 %233 }
 0x231   :  { %v237_v41 = vmul.f32 0.03125, %v234_v40 }
 0x233   :  { %v239_v42 = vadd.f32 1e-05, %v237_v41 }
 0x234   :  { %v236_v43 = vpop.xlane.xlu1 %235 }
 0x235   :  { %681 = vrsqrt.f32 %v239_v42  ;;  %v238_v44 = vmul.f32 0.03125, %v236_v43  ;;  %v548_v43 = vld [vmem:[%s979_s8] ss:$0 sm:$0xff] }
 0x237   :  { %v240_v45 = vadd.f32 1e-05, %v238_v44 }
 0x239   :  { %683 = vrsqrt.f32 %v240_v45 }
 0x242   :  { %v682_v47 = vpop.eup %681 }
 0x243   :  { %v249_v48 = vmul.f32 %v682_v47, %v542_v46 }
 0x245   :  { %v251_v50 = vmul.f32 %v249_v48, %v933_v16 }
 0x246   :  { %v684_v51 = vpop.eup %683 }
 0x247   :  { %v259_v52 = vadd.f32 %v543_v49, %v251_v50  ;;  %v250_v53 = vmul.f32 %v684_v51, %v542_v46 }
 0x249   :  { %v263_v54 = vmin.f32 %v259_v52, 0.0  ;;  %v252_v55 = vmul.f32 %v250_v53, %v937_v20  ;;  %vm261_vm3 = vcmp.gt.f32.partialorder %v259_v52, 0.0  ;;  %v438_v20 = vld [vmem:[#allocation9 + $0x68] sm:$0xff] }
 0x24a   :  { %641 = vmatprep.subr.mxu0 %v438_v20 }
 0x24b   :  { %v265_v56 = vmul.f32 1.442695, %v263_v54  ;;  %v260_v57 = vadd.f32 %v543_v49, %v252_v55  ;;  %642 = vmatpush3.msra.mxu0 %v438_v20 }
 0x24c   :  { %643 = vmatprep.subr.mxu0 %v437_v21 }
 0x24d   :  { %685 = vpow2.f32 %v265_v56  ;;  %v264_v58 = vmin.f32 %v260_v57, 0.0  ;;  %vm262_vm4 = vcmp.gt.f32.partialorder %v260_v57, 0.0  ;;  %644 = vmatpush3.msra.mxu0 %v437_v21 }
 0x24e   :  { %645 = vmatprep.subr.mxu0 %v436_v22 }
 0x24f   :  { %v267_v59 = vmul.f32 1.442695, %v264_v58  ;;  %646 = vmatpush3.msra.mxu0 %v436_v22 }
 0x250   :  { %647 = vmatprep.subr.mxu0 %v435_v23 }
 0x251   :  { %687 = vpow2.f32 %v267_v59  ;;  %648 = vmatpush3.msra.mxu0 %v435_v23  ;;  %v551_v59 = vld [vmem:[#allocation10] ss:$0 sm:$0xff] }
 0x25a   :  { %v686_v60 = vpop.eup %685 }
 0x25b   :  { %v544_v61 = vadd.f32 -1.0, %v686_v60 }
 0x25d   :  { %v271_v62 = vsel %vm261_vm3, %v259_v52, %v544_v61 }
 0x25e   :  { %v688_v63 = vpop.eup %687  ;;  %634 = vmatprep.mubr.f32.mxu1 %v271_v62 }
 0x25f   :  { %v545_v0 = vadd.f32 -1.0, %v688_v63 }
 0x261   :  { %v272_v1 = vsel %vm262_vm4, %v260_v57, %v545_v0 }
 0x262   :  { %635 = vmatmul.mubr.f32.vlgmr.msra.gmra.mxu1 %v272_v1 }
 0x322   :  { %v636_v3 = vpop.f32.mrf.mxu1 }
 0x323   :  { %v368_v4 = vadd.f32 %v636_v3, %v546_v2 }
 0x324   :  { %v362_v5 = vpop.f32.mrf.mxu1 }
 0x325   :  { %v363_v6 = vadd.f32 %v546_v2, %v362_v5  ;;  %375 = vadd.xlane.f32.xlu1 %v368_v4 }
 0x327   :  { %373 = vadd.xlane.f32.xlu0 %v363_v6 }
 0x3ae   :  { %v376_v7 = vpop.xlane.xlu1 %375 }
 0x3af   :  { %v378_v8 = vmul.f32 0.03125, %v376_v7 }
 0x3b0   :  { %v374_v9 = vpop.xlane.xlu0 %373 }
 0x3b1   :  { %v949_v10 = vsub.f32 %v368_v4, %v378_v8  ;;  %v377_v11 = vmul.f32 0.03125, %v374_v9 }
 0x3b3   :  { %v951_v12 = vsub.f32 %v363_v6, %v377_v11  ;;  %v382_v13 = vmul.f32 %v931_v15, %v949_v10 }
 0x3b5   :  { %v384_v14 = vmul.f32 %v382_v13, %v382_v13  ;;  %v381_v16 = vmul.f32 %v931_v15, %v951_v12  ;;  %v434_v15 = vld [vmem:[#allocation9 + $0x48] sm:$0xff] }
 0x3b6   :  { %649 = vmatprep.subr.mxu0 %v434_v15 }
 0x3b7   :  { %387 = vadd.xlane.f32.xlu1 %v384_v14  ;;  %v383_v17 = vmul.f32 %v381_v16, %v381_v16  ;;  %650 = vmatpush3.msra.mxu0 %v434_v15 }
 0x3b8   :  { %651 = vmatprep.subr.mxu0 %v433_v24 }
 0x3b9   :  { %385 = vadd.xlane.f32.xlu0 %v383_v17  ;;  %652 = vmatpush3.msra.mxu0 %v433_v24 }
 0x3ba   :  { %653 = vmatprep.subr.mxu0 %v432_v25 }
 0x3bb   :  { %654 = vmatpush3.msra.mxu0 %v432_v25 }
 0x3bc   :  { %655 = vmatprep.subr.mxu0 %v431_v26 }
 0x3bd   :  { %656 = vmatpush3.msra.mxu0 %v431_v26 }
 0x3be   :  { %657 = vmatprep.subr.mxu0 %v430_v27 }
 0x3bf   :  { %658 = vmatpush3.msra.mxu0 %v430_v27 }
 0x3c0   :  { %659 = vmatprep.subr.mxu0 %v429_v28 }
 0x3c1   :  { %660 = vmatpush3.msra.mxu0 %v429_v28 }
 0x3c2   :  { %661 = vmatprep.subr.mxu0 %v428_v29 }
 0x3c3   :  { %662 = vmatpush3.msra.mxu0 %v428_v29 }
 0x3c4   :  { %663 = vmatprep.subr.mxu0 %v427_v30 }
 0x3c5   :  { %664 = vmatpush3.msra.mxu0 %v427_v30 }
 0x3c6   :  { %665 = vmatprep.subr.mxu0 %v426_v31 }
 0x3c7   :  { %666 = vmatpush3.msra.mxu0 %v426_v31 }
 0x3c8   :  { %667 = vmatprep.subr.mxu0 %v425_v32 }
 0x3c9   :  { %668 = vmatpush3.msra.mxu0 %v425_v32 }
 0x440   :  { %v388_v33 = vpop.xlane.xlu1 %387 }
 0x441   :  { %v390_v34 = vmul.f32 0.03125, %v388_v33 }
 0x442   :  { %v386_v35 = vpop.xlane.xlu0 %385 }
 0x443   :  { %v392_v36 = vadd.f32 1e-05, %v390_v34  ;;  %v389_v37 = vmul.f32 0.03125, %v386_v35 }
 0x445   :  { %689 = vrsqrt.f32 %v392_v36  ;;  %v391_v38 = vadd.f32 1e-05, %v389_v37 }
 0x447   :  { %691 = vrsqrt.f32 %v391_v38 }
 0x452   :  { %v690_v40 = vpop.eup %689 }
 0x453   :  { %v402_v41 = vmul.f32 %v690_v40, %v547_v39 }
 0x454   :  { %v692_v42 = vpop.eup %691 }
 0x455   :  { %v401_v44 = vmul.f32 %v692_v42, %v547_v39  ;;  %v404_v45 = vmul.f32 %v402_v41, %v949_v10 }
 0x457   :  { %v403_v46 = vmul.f32 %v401_v44, %v951_v12  ;;  %v412_v47 = vadd.f32 %v548_v43, %v404_v45 }
 0x459   :  { %v411_v48 = vadd.f32 %v548_v43, %v403_v46  ;;  %v416_v49 = vmin.f32 %v412_v47, 0.0  ;;  %vm414_vm6 = vcmp.gt.f32.partialorder %v412_v47, 0.0 }
 0x45b   :  { %v415_v50 = vmin.f32 %v411_v48, 0.0  ;;  %v419_v51 = vmul.f32 1.442695, %v416_v49  ;;  %vm413_vm5 = vcmp.gt.f32.partialorder %v411_v48, 0.0 }
 0x45d   :  { %v417_v52 = vmul.f32 1.442695, %v415_v50  ;;  %693 = vpow2.f32 %v419_v51 }
 0x45f   :  { %695 = vpow2.f32 %v417_v52 }
 0x46a   :  { %v694_v53 = vpop.eup %693 }
 0x46b   :  { %v550_v55 = vadd.f32 -1.0, %v694_v53 }
 0x46c   :  { %v696_v54 = vpop.eup %695 }
 0x46d   :  { %v549_v56 = vadd.f32 -1.0, %v696_v54  ;;  %v424_v58 = vsel %vm414_vm6, %v412_v47, %v550_v55 }
 0x46f   :  { %v423_v57 = vsel %vm413_vm5, %v411_v48, %v549_v56 }
 0x470   :  { %669 = vmatprep.mubr.f32.mxu0 %v423_v57 }
 0x471   :  { %670 = vmatmul.mubr.f32.vlgmr.msra.gmra.mxu0 %v424_v58 }
 0x531   :  { %v671_v60 = vpop.f32.mrf.mxu0 }
 0x532   :  { %v520_v61 = vadd.f32 %v671_v60, %v551_v59 }
 0x533   :  { %v514_v62 = vpop.f32.mrf.mxu0 }
 0x534   :  { %697 = vtanh.f32 %v520_v61  ;;  %v515_v63 = vadd.f32 %v551_v59, %v514_v62 }
 0x536   :  { %699 = vtanh.f32 %v515_v63 }
 0x541   :  { %v698_v0 = vpop.eup %697 }
 0x542   :  { %v526_v1 = vmul.f32 2.5, %v698_v0 }
 0x543   :  { %v700_v2 = vpop.eup %699 }
 0x544   :  { %528 = vst [vmem:[%s982_s11 + $0x8] sm:$0xff] %v526_v1  ;;  %v525_v3 = vmul.f32 2.5, %v700_v2 }
 0x546   :  { %527 = vst [vmem:[%s982_s11] sm:$0xff] %v525_v3 }
 0x547   :  { %533 = vsyncpa [#allocation3], 1 }
 0x548   :  { %534 = vsyncpa [#allocation5], 1 }
 0x549   :  { %535 = vsyncpa [#allocation8], 1 }
 0x54a   :  { %536 = vsyncpa [#allocation11], 1 }

</bundles_post_ra>
